<compile_context>
chip_gen: v6e
topology: v6e:2x2x1
jax: 0.10.0
libtpu: 0.0.40
codegen_flags: <defaults>
</compile_context>

<pallas_src>
import functools
import math

import jax
import jax.numpy as jnp
from jax import lax
from jax.experimental import pallas as pl
from jax.experimental.pallas import tpu as pltpu


def _round_up(x, m):
    return (x + m - 1) // m * m


def _flash_self_attention_kernel(xq_ref, xkv_ref, wq_ref, wkv_ref, o_ref,
                                 q_scr, m_scr, l_scr, acc_scr,
                                 *, scale, seq_len, ap, tk):
    ki = pl.program_id(2)

    @pl.when(ki == 0)
    def _init():
        # Q projection for this query tile; fold 1/sqrt(A) into Q (scales tq*A elements
        # instead of the tq*tk score tile every step).
        q_scr[...] = jnp.dot(xq_ref[0], wq_ref[...],
                             preferred_element_type=jnp.float32) * scale
        m_scr[...] = jnp.full_like(m_scr, -jnp.inf)
        l_scr[...] = jnp.zeros_like(l_scr)
        acc_scr[...] = jnp.zeros_like(acc_scr)

    # Fused K/V projection: one MXU pass over x_kv against [Wk^T | Wv^T].
    kv = jnp.dot(xkv_ref[0], wkv_ref[...], preferred_element_type=jnp.float32)  # (tk, 2*Ap)
    k = kv[:, :ap]
    v = kv[:, ap:]

    # scores = Q K^T, contracting the last dims of both operands (no transpose).
    scores = lax.dot_general(q_scr[...], k,
                             dimension_numbers=(((1,), (1,)), ((), ())),
                             preferred_element_type=jnp.float32)                # (tq, tk)

    # Mask key positions that are sequence padding (T was rounded up to the tile size).
    kv_pos = ki * tk + lax.broadcasted_iota(jnp.int32, scores.shape, 1)
    scores = jnp.where(kv_pos < seq_len, scores, -1e30)

    # Online (flash) softmax update.
    m_prev = m_scr[...]
    m_new = jnp.maximum(m_prev, jnp.max(scores, axis=-1, keepdims=True))
    alpha = jnp.exp(m_prev - m_new)
    p = jnp.exp(scores - m_new)
    l_scr[...] = alpha * l_scr[...] + jnp.sum(p, axis=-1, keepdims=True)
    acc_scr[...] = alpha * acc_scr[...] + jnp.dot(p, v, preferred_element_type=jnp.float32)
    m_scr[...] = m_new

    @pl.when(ki == pl.num_programs(2) - 1)
    def _finalize():
        inv = pl.reciprocal(l_scr[...], approx=True)
        o_ref[0] = (acc_scr[...] * inv).astype(o_ref.dtype)


def self_attention(embedded, wq, wk, wv, attention_dim, *, max_tile=128):
    """embedded: (B, T, E) f32; wq/wk/wv: (E, A) f32 (transposed nn.Linear weights)."""
    B, T, E = embedded.shape
    A = wq.shape[1]
    scale = 1.0 / math.sqrt(float(attention_dim))

    # Lane-dense padding for feature dims, sublane/tile padding for the sequence dim.
    Ep = _round_up(E, 128)
    Ap = _round_up(A, 128)
    tile = min(max_tile, _round_up(T, 8))
    Tp = _round_up(T, tile)
    tq = tk = tile

    xp = jnp.zeros((B, Tp, Ep), jnp.float32).at[:, :T, :E].set(embedded)
    wq_p = jnp.zeros((Ep, Ap), jnp.float32).at[:E, :A].set(wq)
    wkv_p = (jnp.zeros((Ep, 2 * Ap), jnp.float32)
             .at[:E, :A].set(wk)
             .at[:E, Ap:Ap + A].set(wv))

    kernel = functools.partial(_flash_self_attention_kernel,
                               scale=scale, seq_len=T, ap=Ap, tk=tk)

    out_p = pl.pallas_call(
        kernel,
        out_shape=jax.ShapeDtypeStruct((B, Tp, Ap), jnp.float32),
        grid_spec=pltpu.PrefetchScalarGridSpec(
            num_scalar_prefetch=0,
            grid=(B, Tp // tq, Tp // tk),
            in_specs=[
                pl.BlockSpec((1, tq, Ep), lambda b, qi, ki: (b, qi, 0)),   # x for the Q tile
                pl.BlockSpec((1, tk, Ep), lambda b, qi, ki: (b, ki, 0)),   # x for the KV tile
                pl.BlockSpec((Ep, Ap), lambda b, qi, ki: (0, 0)),          # Wq^T (padded, shared)
                pl.BlockSpec((Ep, 2 * Ap), lambda b, qi, ki: (0, 0)),      # [Wk^T | Wv^T] fused
            ],
            out_specs=pl.BlockSpec((1, tq, Ap), lambda b, qi, ki: (b, qi, 0)),
            scratch_shapes=[
                pltpu.VMEM((tq, Ap), jnp.float32),   # scaled Q tile
                pltpu.VMEM((tq, 1), jnp.float32),    # running max
                pltpu.VMEM((tq, 1), jnp.float32),    # running denominator
                pltpu.VMEM((tq, Ap), jnp.float32),   # output accumulator
            ],
        ),
        compiler_params=pltpu.CompilerParams(
            dimension_semantics=("parallel", "parallel", "arbitrary")),
    )(xp, xp, wq_p, wkv_p)

    return out_p[:, :T, :A]


def self_attention_ref(embedded, wq, wk, wv, attention_dim):
    q = embedded @ wq
    k = embedded @ wk
    v = embedded @ wv
    scores = jnp.einsum("btd,bsd->bts", q, k) / jnp.sqrt(jnp.float32(attention_dim))
    w = jax.nn.softmax(scores, axis=-1)
    return jnp.einsum("bts,bsd->btd", w, v)


if __name__ == "__main__":
    embedding_dim = 2
    attention_dim = 3

    # Deterministic input (same values as the PyTorch module's `embedded`).
    embedded = jnp.array(
        [[[-1.4381, 0.1232], [-0.108, 0.3458]],
         [[0.1929, -0.8567], [-0.116, 1.2547]]],
        dtype=jnp.float32,
    )  # (B=2, T=2, E=2)

    # TODO(synk): torch.manual_seed(0) nn.Linear init values are not reproducible in JAX;
    # using a deterministic PRNGKey(0) uniform init of the same shape/scale instead.
    # Weights are stored pre-transposed as (E, A) so the kernel computes x @ W (== Linear's x @ W.T).
    key = jax.random.PRNGKey(0)
    kq, kk, kv = jax.random.split(key, 3)
    bound = 1.0 / math.sqrt(embedding_dim)
    wq = jax.random.uniform(kq, (embedding_dim, attention_dim), jnp.float32, -bound, bound)
    wk = jax.random.uniform(kk, (embedding_dim, attention_dim), jnp.float32, -bound, bound)
    wv = jax.random.uniform(kv, (embedding_dim, attention_dim), jnp.float32, -bound, bound)

    out = jax.block_until_ready(self_attention(embedded, wq, wk, wv, attention_dim))

    ref = self_attention_ref(embedded, wq, wk, wv, attention_dim)
    assert out.shape == (2, 2, attention_dim)
    # Tolerance covers the approx EUP reciprocal used in the softmax normalization.
    assert jnp.allclose(out, ref, atol=2e-3, rtol=2e-3), (out, ref)

    print("KERNEL_OK")
</pallas_src>

<mosaic_0001>
module attributes {stable_mosaic.version = 11 : i64} {
  func.func @_flash_self_attention_kernel(%arg0: i32, %arg1: i32, %arg2: i32, %arg3: memref<1x8x128xf32, #tpu.memory_space<vmem>>, %arg4: memref<1x8x128xf32, #tpu.memory_space<vmem>>, %arg5: memref<128x128xf32, #tpu.memory_space<vmem>>, %arg6: memref<128x256xf32, #tpu.memory_space<vmem>>, %arg7: memref<1x8x128xf32, #tpu.memory_space<vmem>>, %arg8: memref<8x128xf32, #tpu.memory_space<vmem>>, %arg9: memref<8x1xf32, #tpu.memory_space<vmem>>, %arg10: memref<8x1xf32, #tpu.memory_space<vmem>>, %arg11: memref<8x128xf32, #tpu.memory_space<vmem>>) attributes {dimension_semantics = [#tpu.dimension_semantics<parallel>, #tpu.dimension_semantics<parallel>, #tpu.dimension_semantics<arbitrary>], iteration_bounds = array<i64: 2, 1, 1>, scalar_prefetch = 0 : i64, scratch_operands = 4 : i64, tpu.core_type = #tpu.core_type<tc>, window_params = [{transform_indices = @transform_0, window_bounds = array<i64: 1, 8, 128>}, {transform_indices = @transform_1, window_bounds = array<i64: 1, 8, 128>}, {pipeline_mode = #tpu.pipeline_mode<synchronous>, transform_indices = @transform_2, window_bounds = array<i64: 128, 128>}, {pipeline_mode = #tpu.pipeline_mode<synchronous>, transform_indices = @transform_3, window_bounds = array<i64: 128, 256>}, {transform_indices = @transform_4, window_bounds = array<i64: 1, 8, 128>}]} {
    %c0_i32 = arith.constant 0 : i32
    %0 = arith.cmpi eq, %arg2, %c0_i32 : i32
    %1 = arith.extui %0 : i1 to i32
    %c0_i32_0 = arith.constant 0 : i32
    %2 = arith.cmpi ne, %1, %c0_i32_0 : i32
    scf.if %2 {
      %c0_26 = arith.constant 0 : index
      %c0_27 = arith.constant 0 : index
      %c0_28 = arith.constant 0 : index
      %44 = vector.load %arg3[%c0_26, %c0_27, %c0_28] : memref<1x8x128xf32, #tpu.memory_space<vmem>>, vector<1x8x128xf32>
      %45 = vector.shape_cast %44 : vector<1x8x128xf32> to vector<8x128xf32>
      %c0_29 = arith.constant 0 : index
      %c0_30 = arith.constant 0 : index
      %46 = vector.load %arg5[%c0_29, %c0_30] : memref<128x128xf32, #tpu.memory_space<vmem>>, vector<128x128xf32>
      %cst_31 = arith.constant dense<0.000000e+00> : vector<8x128xf32>
      %47 = tpu.matmul %45, %46, %cst_31 {dimension_numbers = #tpu.dot_dimension_numbers<[1], [0], [0], [1], [0, 0, 1, 1], [], []>} : vector<8x128xf32>, vector<128x128xf32>, vector<8x128xf32> -> vector<8x128xf32>
      %cst_32 = arith.constant 0.577350259 : f32
      %48 = vector.broadcast %cst_32 : f32 to vector<8x128xf32>
      %49 = arith.mulf %47, %48 : vector<8x128xf32>
      %c0_33 = arith.constant 0 : index
      %c0_34 = arith.constant 0 : index
      %50 = vector.load %arg8[%c0_33, %c0_34] : memref<8x128xf32, #tpu.memory_space<vmem>>, vector<8x128xf32>
      tpu.vector_store %arg8[%c0_33, %c0_34], %49 {strides = array<i32>} : memref<8x128xf32, #tpu.memory_space<vmem>>, vector<8x128xf32>,
      %cst_35 = arith.constant 0xFF800000 : f32
      %51 = vector.broadcast %cst_35 : f32 to vector<8x1xf32>
      %c0_36 = arith.constant 0 : index
      %c0_37 = arith.constant 0 : index
      %52 = vector.load %arg9[%c0_36, %c0_37] : memref<8x1xf32, #tpu.memory_space<vmem>>, vector<8x1xf32>
      tpu.vector_store %arg9[%c0_36, %c0_37], %51 {strides = array<i32>} : memref<8x1xf32, #tpu.memory_space<vmem>>, vector<8x1xf32>,
      %cst_38 = arith.constant 0.000000e+00 : f32
      %53 = vector.broadcast %cst_38 : f32 to vector<8x1xf32>
      %c0_39 = arith.constant 0 : index
      %c0_40 = arith.constant 0 : index
      %54 = vector.load %arg10[%c0_39, %c0_40] : memref<8x1xf32, #tpu.memory_space<vmem>>, vector<8x1xf32>
      tpu.vector_store %arg10[%c0_39, %c0_40], %53 {strides = array<i32>} : memref<8x1xf32, #tpu.memory_space<vmem>>, vector<8x1xf32>,
      %cst_41 = arith.constant 0.000000e+00 : f32
      %55 = vector.broadcast %cst_41 : f32 to vector<8x128xf32>
      %c0_42 = arith.constant 0 : index
      %c0_43 = arith.constant 0 : index
      %56 = vector.load %arg11[%c0_42, %c0_43] : memref<8x128xf32, #tpu.memory_space<vmem>>, vector<8x128xf32>
      tpu.vector_store %arg11[%c0_42, %c0_43], %55 {strides = array<i32>} : memref<8x128xf32, #tpu.memory_space<vmem>>, vector<8x128xf32>,
    } else {
    }
    %c0 = arith.constant 0 : index
    %c0_1 = arith.constant 0 : index
    %c0_2 = arith.constant 0 : index
    %3 = vector.load %arg4[%c0, %c0_1, %c0_2] : memref<1x8x128xf32, #tpu.memory_space<vmem>>, vector<1x8x128xf32>
    %4 = vector.shape_cast %3 : vector<1x8x128xf32> to vector<8x128xf32>
    %c0_3 = arith.constant 0 : index
    %c0_4 = arith.constant 0 : index
    %5 = vector.load %arg6[%c0_3, %c0_4] : memref<128x256xf32, #tpu.memory_space<vmem>>, vector<128x256xf32>
    %cst = arith.constant dense<0.000000e+00> : vector<8x256xf32>
    %6 = tpu.matmul %4, %5, %cst {dimension_numbers = #tpu.dot_dimension_numbers<[1], [0], [0], [1], [0, 0, 1, 1], [], []>} : vector<8x128xf32>, vector<128x256xf32>, vector<8x256xf32> -> vector<8x256xf32>
    %7 = vector.extract_strided_slice %6 {offsets = [0, 0], sizes = [8, 128], strides = [1, 1]} : vector<8x256xf32> to vector<8x128xf32>
    %8 = vector.extract_strided_slice %6 {offsets = [0, 128], sizes = [8, 128], strides = [1, 1]} : vector<8x256xf32> to vector<8x128xf32>
    %c0_5 = arith.constant 0 : index
    %c0_6 = arith.constant 0 : index
    %9 = vector.load %arg8[%c0_5, %c0_6] : memref<8x128xf32, #tpu.memory_space<vmem>>, vector<8x128xf32>
    %cst_7 = arith.constant dense<0.000000e+00> : vector<8x8xf32>
    %10 = tpu.matmul %9, %7, %cst_7 {dimension_numbers = #tpu.dot_dimension_numbers<[1], [1], [0], [0], [0, 0, 1, 0], [], []>} : vector<8x128xf32>, vector<8x128xf32>, vector<8x8xf32> -> vector<8x8xf32>
    %c8_i32 = arith.constant 8 : i32
    %11 = arith.muli %arg2, %c8_i32 : i32
    %12 = tpu.iota {dimensions = array<i32: 1>} : vector<8x8xi32>
    %13 = vector.broadcast %11 : i32 to vector<8x8xi32>
    %14 = arith.addi %13, %12 : vector<8x8xi32>
    %c2_i32 = arith.constant 2 : i32
    %15 = vector.broadcast %c2_i32 : i32 to vector<8x8xi32>
    %16 = arith.cmpi slt, %14, %15 : vector<8x8xi32>
    %cst_8 = arith.constant -1.000000e+30 : f32
    %17 = vector.broadcast %cst_8 : f32 to vector<8x8xf32>
    %18 = arith.select %16, %10, %17 : vector<8x8xi1>, vector<8x8xf32>
    %c0_9 = arith.constant 0 : index
    %c0_10 = arith.constant 0 : index
    %19 = vector.load %arg9[%c0_9, %c0_10] : memref<8x1xf32, #tpu.memory_space<vmem>>, vector<8x1xf32>
    %cst_11 = arith.constant dense<0xFF800000> : vector<8xf32>
    %20 = vector.multi_reduction <maximumf>, %18, %cst_11 [1] : vector<8x8xf32> to vector<8xf32>
    %21 = vector.shape_cast %20 : vector<8xf32> to vector<8x1xf32>
    %22 = arith.maximumf %19, %21 : vector<8x1xf32>
    %23 = arith.subf %19, %22 : vector<8x1xf32>
    %24 = math.exp %23 : vector<8x1xf32>
    %25 = vector.broadcast %22 : vector<8x1xf32> to vector<8x8xf32>
    %26 = arith.subf %18, %25 : vector<8x8xf32>
    %27 = math.exp %26 : vector<8x8xf32>
    %c0_12 = arith.constant 0 : index
    %c0_13 = arith.constant 0 : index
    %28 = vector.load %arg10[%c0_12, %c0_13] : memref<8x1xf32, #tpu.memory_space<vmem>>, vector<8x1xf32>
    %29 = arith.mulf %24, %28 : vector<8x1xf32>
    %cst_14 = arith.constant dense<0.000000e+00> : vector<8xf32>
    %30 = vector.multi_reduction <add>, %27, %cst_14 [1] : vector<8x8xf32> to vector<8xf32>
    %31 = vector.shape_cast %30 : vector<8xf32> to vector<8x1xf32>
    %32 = arith.addf %29, %31 : vector<8x1xf32>
    %c0_15 = arith.constant 0 : index
    %c0_16 = arith.constant 0 : index
    %33 = vector.load %arg10[%c0_15, %c0_16] : memref<8x1xf32, #tpu.memory_space<vmem>>, vector<8x1xf32>
    tpu.vector_store %arg10[%c0_15, %c0_16], %32 {strides = array<i32>} : memref<8x1xf32, #tpu.memory_space<vmem>>, vector<8x1xf32>,
    %c0_17 = arith.constant 0 : index
    %c0_18 = arith.constant 0 : index
    %34 = vector.load %arg11[%c0_17, %c0_18] : memref<8x128xf32, #tpu.memory_space<vmem>>, vector<8x128xf32>
    %35 = vector.broadcast %24 : vector<8x1xf32> to vector<8x128xf32>
    %36 = arith.mulf %35, %34 : vector<8x128xf32>
    %cst_19 = arith.constant dense<0.000000e+00> : vector<8x128xf32>
    %37 = tpu.matmul %27, %8, %cst_19 {dimension_numbers = #tpu.dot_dimension_numbers<[1], [0], [0], [1], [0, 0, 1, 1], [], []>} : vector<8x8xf32>, vector<8x128xf32>, vector<8x128xf32> -> vector<8x128xf32>
    %38 = arith.addf %36, %37 : vector<8x128xf32>
    %c0_20 = arith.constant 0 : index
    %c0_21 = arith.constant 0 : index
    %39 = vector.load %arg11[%c0_20, %c0_21] : memref<8x128xf32, #tpu.memory_space<vmem>>, vector<8x128xf32>
    tpu.vector_store %arg11[%c0_20, %c0_21], %38 {strides = array<i32>} : memref<8x128xf32, #tpu.memory_space<vmem>>, vector<8x128xf32>,
    %c0_22 = arith.constant 0 : index
    %c0_23 = arith.constant 0 : index
    %40 = vector.load %arg9[%c0_22, %c0_23] : memref<8x1xf32, #tpu.memory_space<vmem>>, vector<8x1xf32>
    tpu.vector_store %arg9[%c0_22, %c0_23], %22 {strides = array<i32>} : memref<8x1xf32, #tpu.memory_space<vmem>>, vector<8x1xf32>,
    %c0_i32_24 = arith.constant 0 : i32
    %41 = arith.cmpi eq, %arg2, %c0_i32_24 : i32
    %42 = arith.extui %41 : i1 to i32
    %c0_i32_25 = arith.constant 0 : i32
    %43 = arith.cmpi ne, %42, %c0_i32_25 : i32
    scf.if %43 {
      %c0_26 = arith.constant 0 : index
      %c0_27 = arith.constant 0 : index
      %44 = vector.load %arg10[%c0_26, %c0_27] : memref<8x1xf32, #tpu.memory_space<vmem>>, vector<8x1xf32>
      %45 = tpu.reciprocal %44 {approx = true} : vector<8x1xf32> -> vector<8x1xf32>
      %c0_28 = arith.constant 0 : index
      %c0_29 = arith.constant 0 : index
      %46 = vector.load %arg11[%c0_28, %c0_29] : memref<8x128xf32, #tpu.memory_space<vmem>>, vector<8x128xf32>
      %47 = vector.broadcast %45 : vector<8x1xf32> to vector<8x128xf32>
      %48 = arith.mulf %46, %47 : vector<8x128xf32>
      %c0_30 = arith.constant 0 : index
      %c0_31 = arith.constant 0 : index
      %c0_32 = arith.constant 0 : index
      %49 = vector.load %arg7[%c0_30, %c0_31, %c0_32] : memref<1x8x128xf32, #tpu.memory_space<vmem>>, vector<1x8x128xf32>
      %50 = vector.shape_cast %49 : vector<1x8x128xf32> to vector<8x128xf32>
      %51 = vector.shape_cast %48 : vector<8x128xf32> to vector<1x8x128xf32>
      tpu.vector_store %arg7[%c0_30, %c0_31, %c0_32], %51 {strides = array<i32>} : memref<1x8x128xf32, #tpu.memory_space<vmem>>, vector<1x8x128xf32>,
    } else {
    }
    return
  }
  func.func @transform_0(%arg0: i32, %arg1: i32, %arg2: i32) -> (i32, i32, i32) {
    %c0_i32 = arith.constant 0 : i32
    %c0_i32_0 = arith.constant 0 : i32
    return %arg0, %arg1, %c0_i32 : i32, i32, i32
  }
  func.func @transform_1(%arg0: i32, %arg1: i32, %arg2: i32) -> (i32, i32, i32) {
    %c0_i32 = arith.constant 0 : i32
    %c0_i32_0 = arith.constant 0 : i32
    return %arg0, %arg2, %c0_i32 : i32, i32, i32
  }
  func.func @transform_2(%arg0: i32, %arg1: i32, %arg2: i32) -> (i32, i32) {
    %c0_i32 = arith.constant 0 : i32
    %c0_i32_0 = arith.constant 0 : i32
    %c0_i32_1 = arith.constant 0 : i32
    return %c0_i32, %c0_i32_0 : i32, i32
  }
  func.func @transform_3(%arg0: i32, %arg1: i32, %arg2: i32) -> (i32, i32) {
    %c0_i32 = arith.constant 0 : i32
    %c0_i32_0 = arith.constant 0 : i32
    %c0_i32_1 = arith.constant 0 : i32
    return %c0_i32, %c0_i32_0 : i32, i32
  }
  func.func @transform_4(%arg0: i32, %arg1: i32, %arg2: i32) -> (i32, i32, i32) {
    %c0_i32 = arith.constant 0 : i32
    %c0_i32_0 = arith.constant 0 : i32
    return %arg0, %arg1, %c0_i32 : i32, i32, i32
  }
}

</mosaic_0001>

<bundles_post_ra>
// kernel: tpu_custom_call.1
= control target key start
LH: loop header
LB: loop body
LE: loop exit
PB: predicated region body
PF: predicated region fallthrough
CT: control target
= control target key end

     0   :  { %s1514_s0 = inlined_call_operand.hbm [shape: f32[2,8,128], index: 0, kind: input, shape index: {}]   ;;  %s1515_s1 = inlined_call_operand.hbm [shape: f32[2,8,128], index: 1, kind: input, shape index: {}]   ;;  %s1516_s2 = inlined_call_operand.hbm [shape: f32[128,128], index: 2, kind: input, shape index: {}]   ;;  %s1517_s3 = inlined_call_operand.hbm [shape: f32[128,256], index: 3, kind: input, shape index: {}]   ;;  %s1518_s4 = inlined_call_operand.hbm [shape: f32[2,8,128], index: 4, kind: output, shape index: {}]  }
   0x1   :  { %1520 = sst [smem:[#allocation20_spill]] %s1514_s0 }
   0x2   :  { %1521 = sst [smem:[#allocation21_spill]] %s1515_s1 }
   0x3   :  { %9 = vsyncpa [#allocation7], 0 }
   0x4   :  { %11 = vsyncpa [#allocation7 + $0x1], 0 }
   0x5   :  { %12 = vsyncpa [#allocation10], 0 }
   0x6   :  { %14 = vsyncpa [#allocation10 + $0x1], 0 }
   0x7   :  { %15 = vsyncpa [#allocation13], 0 }
   0x8   :  { %16 = vsyncpa [#allocation8], 0 }
   0x9   :  { %18 = vsyncpa [#allocation8 + $0x1], 0  ;;  %s1278_s15 = smov 0   ;;  %s1280_s16 = smov 0  }
   0xa   :  { %s1282_s17 = smov 0   ;;  %s1284_s18 = smov 0  }
   0xb   :  { %s1286_s19 = smov 0   ;;  %s1288_s20 = smov 0  }
   0xc LB: > { %s1309_s21 = sadd.s32 4294967295, %s1238_s20   ;;  %s848_s22 = sadd.s32 4294967294, %s1238_s20   ;;  %s1238_s20 = sphi %s1288_s20, %s24_s20   ;;  %s1234_s19 = sphi %s1286_s19, %s1541_s19   ;;  %s1230_s18 = sphi %s1284_s18, %s1540_s18   ;;  %s1226_s17 = sphi %s1282_s17, %s1539_s17   ;;  %s1222_s16 = sphi %s1280_s16, %s1538_s16   ;;  %s1218_s15 = sphi %s1278_s15, %s1537_s15  }
   0xd   : > { %p65_p0 = scmp.ne.s32.totalorder %s1222_s16, %s1218_s15  ;;  %p1519_p1 = scmp.eq.s32.totalorder %s1309_s21, 0 }
   0xe   : > { %p167_p3 = scmp.eq.s32.totalorder %s848_s22, 1  ;;  %p849_p5 = scmp.ge.s32.totalorder %s1238_s20, 1 }
   0xf   : > { %p1318_p4 = por %p1519_p1, %p65_p0  ;;  %p174_p7 = scmp.lt.s32.totalorder %s1238_s20, 3 }
  0x10   : > { %p1323_p6 = por %p167_p3, %p65_p0  ;;  %s1240_s26 = smov [#allocation11]  }
  0x11   : > { %p1328_p8 = pnand %p849_p5, %p174_p7  ;;  %s186_s27 = sshll.u32 %s1240_s26, 4  ;;  %s187_s27 = int_to_ptr.vmem [resolvable:$true] %s186_s27 }
  0x12   : > { %s1523_s24 = scalar_select %p1323_p6, 1, 0 }
  0x13   : > { %p948_p9 = pneg %p1328_p8  ;;  %s1241_s29 = smov [#allocation12]  }
  0x14   : > { %s199_s30 = sshll.u32 %s1241_s29, 4  ;;  %s1049_s5 = scalar_lea.vmem %s187_s27, 2048  ;;  %s200_s30 = int_to_ptr.vmem [resolvable:$true] %s199_s30 }
  0x15   : > { %p1337_p11 = pnand %p948_p9, %p1519_p1  ;;  %p1050_p13 = scmp.ne.s32.totalorder %s187_s27, %s1049_s5 }
  0x16   : > { %p1057_p5 = scmp.lt.s32.totalorder %s187_s27, %s187_s27  ;;  %p1058_p7 = scmp.lt.s32.totalorder %s1049_s5, %s1049_s5 }
  0x17   : > { %p1040_p12 = pneg %p1337_p11 }
  0x18   : > { %p1059_p10 = por %p1058_p7, %p1057_p5 }
  0x19   : > { %p1052_p0 = pnand %p1050_p13, %p1040_p12 }
  0x1b   : > { %p1053_p3 = pneg %p1052_p0 }
  0x1d   : > { %p1060_p9 = pnand %p1059_p10, %p1053_p3 }
  0x1f   : > { %1063 = shalt.err (!%p1060_p9)
}
  0x20   : > { %s1242_s6 = smov 128   ;;  %s1243_s7 = smov 8  }
  0x21   : > { %951 = dma.hbm_to_vmem [thread:$0]  (!%p1337_p11), %s1516_s2, 2048, %s187_s27, [#allocation10], %s1242_s6, %s1242_s6, %s1243_s7  }
  0x22   : > { %s1075_s10 = scalar_lea.vmem %s200_s30, 4096  ;;  %p1083_p2 = scmp.lt.s32.totalorder %s200_s30, %s200_s30 }
  0x23   : > { %p1076_p1 = scmp.ne.s32.totalorder %s200_s30, %s1075_s10  ;;  %p1084_p6 = scmp.lt.s32.totalorder %s1075_s10, %s1075_s10 }
  0x25   : > { %p1078_p13 = pnand %p1076_p1, %p1040_p12  ;;  %p1085_p5 = por %p1084_p6, %p1083_p2 }
  0x27   : > { %p1079_p0 = pneg %p1078_p13 }
  0x29   : > { %p1086_p10 = pnand %p1085_p5, %p1079_p0 }
  0x2b   : > { %1089 = shalt.err (!%p1086_p10)
}
  0x2c   : > { %s1244_s11 = smov 256   ;;  %s1245_s12 = smov 16  }
  0x2d   : > { %954 = dma.hbm_to_vmem [thread:$0]  (!%p1337_p11), %s1517_s3, 4096, %s200_s30, [#allocation13], %s1244_s11, %s1244_s11, %s1245_s12  }
  0x2e   : > { %s43_s22 = sadd.s32 1, %s1234_s19  ;;  %s52_s26 = sadd.s32 1, %s1226_s17 }
  0x2f   : > { %p45_p1 = scmp.ge.s32.totalorder %s43_s22, 2  ;;  %p59_p2 = scmp.ne.s32.totalorder %s1226_s17, %s1222_s16 }
  0x30   : > { %p60_p6 = scmp.eq.s32.totalorder %s1238_s20, 0  ;;  %p968_p12 = scmp.lt.s32.totalorder %s1238_s20, 2 }
  0x31   : > { %s1543_s22 = smov (%p45_p1, %s43_s22), 0  ;;  %p1526_p7 = scmp.eq.s32.totalorder %s1309_s21, 1 }
  0x32   : > { %p61_p3 = por %p60_p6, %p59_p2  ;;  %s47_s28 = ssub.s32 %s1234_s19, %s1543_s22 }
  0x33   : > { %p1369_p9 = por %p1526_p7, %p59_p2  ;;  %s213_s29 = sand.u32 1, %s1226_s17  }
  0x34   : > { %p50_p13 = scmp.eq.s32.totalorder %s47_s28, 0  ;;  %s853_s30 = sshll.u32 %s213_s29, 3 }
  0x35   : > { %s854_s5 = sshll.u32 %s1234_s19, 7  ;;  %s1528_s0 = sld [smem:[#allocation20_spill]] }
  0x36   : > { %s1378_s6 = scalar_select %p50_p13, %s1226_s17, %s52_s26  }
  0x37   : > { %s217_s10 = scalar_lea.vmem [#allocation6], %s853_s30  ;;  %p1385_p11 = pnand %p968_p12, %p61_p3 }
  0x38   : > { %s225_s11 = sshll.u32 %s217_s10, 4  ;;  %s1530_s1 = sld [smem:[#allocation21_spill]]  ;;  %s226_s11 = int_to_ptr.vmem [resolvable:$true] %s225_s11 }
  0x39   : > { %s214_s26 = scalar_lea.sflag [#allocation7], %s213_s29  ;;  %p1092_p0 = pneg %p1385_p11 }
  0x3a   : > { %s1103_s7 = scalar_lea.vmem %s226_s11, 128  ;;  %s1246_s8 = smov [#allocation6]  }
  0x3b   : > { %s223_s9 = scalar_lea.hbm %s1528_s0, %s854_s5  ;;  %p1104_p5 = scmp.ne.s32.totalorder %s226_s11, %s1103_s7 }
  0x3c   : > { %s1108_s10 = sshll.u32 %s1246_s8, 4  ;;  %s1109_s10 = int_to_ptr.vmem [resolvable:$false] %s1108_s10 }
  0x3d   : > { %p1106_p10 = pnand %p1104_p5, %p1092_p0  ;;  %s1110_s0 = scalar_lea.vmem %s1109_s10, 256 }
  0x3e   : > { %s1392_s28 = scalar_lea.hbm %s1530_s1, %s854_s5  ;;  %p1111_p2 = scmp.lt.s32.totalorder %s226_s11, %s1109_s10 }
  0x3f   : > { %p1107_p1 = pneg %p1106_p10  ;;  %p1112_p6 = scmp.lt.s32.totalorder %s1110_s0, %s1103_s7 }
  0x41   : > { %p1113_p12 = por %p1112_p6, %p1111_p2 }
  0x43   : > { %p1114_p3 = pnand %p1113_p12, %p1107_p1 }
  0x45   : > { %1117 = shalt.err (!%p1114_p3)
}
  0x46   : > { %958 = dma.hbm_to_vmem [thread:$0]  (!%p1385_p11), %s223_s9, 128, %s226_s11, %s214_s26  }
  0x47   : > { %s232_s29 = sand.u32 1, %s1238_s20   ;;  %s236_s5 = scalar_lea.vmem [#allocation9], %s853_s30 }
  0x48   : > { %s244_s13 = sshll.u32 %s236_s5, 4  ;;  %s233_s14 = scalar_lea.sflag [#allocation10], %s232_s29  ;;  %s245_s13 = int_to_ptr.vmem [resolvable:$true] %s244_s13 }
  0x49   : > { %s1131_s1 = scalar_lea.vmem %s245_s13, 128  ;;  %s1247_s0 = smov [#allocation9]  }
  0x4a   : > { %p1132_p7 = scmp.ne.s32.totalorder %s245_s13, %s1131_s1  ;;  %s1136_s7 = sshll.u32 %s1247_s0, 4  ;;  %s1137_s7 = int_to_ptr.vmem [resolvable:$false] %s1136_s7 }
  0x4b   : > { %s1138_s8 = scalar_lea.vmem %s1137_s7, 256  ;;  %p1139_p10 = scmp.lt.s32.totalorder %s245_s13, %s1137_s7 }
  0x4c   : > { %p1134_p13 = pnand %p1132_p7, %p1092_p0  ;;  %p1140_p1 = scmp.lt.s32.totalorder %s1138_s8, %s1131_s1 }
  0x4e   : > { %p1135_p5 = pneg %p1134_p13  ;;  %p1141_p2 = por %p1140_p1, %p1139_p10 }
  0x50   : > { %p1142_p6 = pnand %p1141_p2, %p1135_p5 }
  0x52   : > { %1145 = shalt.err (!%p1142_p6)
}
  0x53   : > { %961 = dma.hbm_to_vmem [thread:$0]  (!%p1385_p11), %s1392_s28, 128, %s245_s13, %s233_s14  }
  0x54   : > { %253 = sbr.rel (%p1328_p8) target bundleno = 1108 (0x454), region = 36  ;;  %s1411_s30 = sand.u32 (!%p1328_p8), 1, %s1222_s16  }
  0x55   : > { %s1414_s9 = sshll.u32 (!%p1328_p8), %s1411_s30, 3  ;;  %s256_s1 = scalar_lea.sflag (!%p1328_p8), [#allocation7], %s1411_s30 }
  0x56   : > { %s259_s11 = scalar_lea.vmem (!%p1328_p8), [#allocation6], %s1414_s9 }
  0x59   : > { %1197 = dma.done.wait (%p1318_p4), %s256_s1, 128  }
  0x5a   : > { %1199 = vsyncadd (%p1318_p4), %s256_s1, 4294967168  ;;  %s264_s25 = sand.u32 1, %s1309_s21   ;;  %s268_s28 = scalar_lea.vmem [#allocation9], %s1414_s9 }
  0x5b   : > { %s265_s12 = scalar_lea.sflag [#allocation10], %s264_s25 }
  0x5c   : > { %1201 = dma.done.wait (%p1318_p4), %s265_s12, 128  }
  0x5d   : > { %1203 = vsyncadd (%p1318_p4), %s265_s12, 4294967168  ;;  %p1531_p8 = scmp.eq.s32.totalorder %s1309_s21, 0 }
  0x5f   : > { %1205 = dma.done.wait (%p1531_p8), [#allocation10], 2048   ;;  %p1532_p11 = pmov %p1531_p8 }
  0x60   : > { %p1533_p0 = pmov %p1531_p8 }
  0x61   : > { %1207 = vsyncadd (%p1532_p11), [#allocation10], 4294965248 }
  0x62   : > { %1209 = dma.done.wait (%p1533_p0), [#allocation13], 4096   ;;  %p1534_p12 = pmov %p1533_p0 }
  0x63   : > { %v1248_v0 = vmov 0.0   ;;  %vm1249_vm0 = vmmov 0   ;;  %v435_v1 = vld [vmem:[#allocation12 + $0xf8] sm:$0xff]  ;;  %v434_v3 = vld [vmem:[#allocation12 + $0xf0] sm:$0xff]  ;;  %v433_v4 = vld [vmem:[#allocation12 + $0xe8] sm:$0xff]  ;;  %vm399_vm1 = vcmask 7168   ;;  %v579_v57 = vlaneseq }
  0x64   : > { %1211 = vsyncadd (%p1534_p12), [#allocation13], 4294963200  ;;  %889 = vmatprep.subr.mxu0 %v1248_v0  ;;  %921 = vmatprep.mubr.msk.f32.mxu0 %vm1249_vm0, %v1248_v0  ;;  %v326_v2 = vld [vmem:[#allocation11 + $0x78] sm:$0xff]  ;;  %v325_v5 = vld [vmem:[#allocation11 + $0x70] sm:$0xff]  ;;  %v1250_v56 = vmov -inf   ;;  %401 = vst.msk [vmem:[#allocation4] sm:$0xff] %vm399_vm1, %v1248_v0 }
  0x65   : > { %500 = vmatprep.mubr.f32.mxu1 %v1248_v0  ;;  %436 = vmatprep.subr.mxu1 %v435_v1  ;;  %v432_v6 = vld [vmem:[#allocation12 + $0xe0] sm:$0xff]  ;;  %v431_v7 = vld [vmem:[#allocation12 + $0xd8] sm:$0xff]  ;;  %v324_v8 = vld [vmem:[#allocation11 + $0x68] sm:$0xff]  ;;  %400 = vst.msk [vmem:[#allocation3] sm:$0xff] %vm399_vm1, %v1250_v56  ;;  %v580_v58 = vand.u32 127, %v579_v57  ;;  %vm586_vm3 = vcmask 64512  }
  0x66   : > { %890 = vmatpush3.msra.mxu0 %v326_v2  ;;  %437 = vmatpush1.msra.mxu1 %v434_v3  ;;  %v430_v9 = vld [vmem:[#allocation12 + $0xd0] sm:$0xff]  ;;  %v429_v10 = vld [vmem:[#allocation12 + $0xc8] sm:$0xff]  ;;  %v323_v11 = vld [vmem:[#allocation11 + $0x60] sm:$0xff]  ;;  %v1251_v63 = vmov 0   ;;  %s865_s21 = sshll.u32 %s1230_s18, 7  ;;  %s305_s23 = scalar_lea.vmem [#allocation14], %s1414_s9 }
  0x67   : > { %891 = vmatprep.subr.mxu0 %v1248_v0  ;;  %438 = vmatprep.subr.mxu1 %v433_v4  ;;  %v428_v12 = vld [vmem:[#allocation12 + $0xc0] sm:$0xff]  ;;  %v427_v13 = vld [vmem:[#allocation12 + $0xb8] sm:$0xff]  ;;  %v426_v15 = vld [vmem:[#allocation12 + $0xb0] sm:$0xff]  ;;  %vm583_vm2 = vcmp.lt.s32.totalorder %v580_v58, 2  ;;  %s721_s26 = sshll.u32 %s305_s23, 4  ;;  %s719_s5 = scalar_lea.hbm %s1518_s4, %s865_s21  ;;  %s722_s26 = int_to_ptr.vmem [resolvable:$true] %s721_s26 }
  0x68   : > { %892 = vmatpush3.msra.mxu0 %v325_v5  ;;  %439 = vmatpush1.msra.mxu1 %v432_v6  ;;  %v322_v14 = vld [vmem:[#allocation11 + $0x58] sm:$0xff]  ;;  %v425_v16 = vld [vmem:[#allocation12 + $0xa8] sm:$0xff]  ;;  %v321_v17 = vld [vmem:[#allocation11 + $0x50] sm:$0xff]  ;;  %s707_s13 = scalar_lea.sflag [#allocation8], %s1411_s30  ;;  %s1146_s14 = scalar_lea.vmem %s722_s26, 128 }
  0x69   : > { %893 = vmatprep.subr.mxu0 %v1248_v0  ;;  %440 = vmatprep.subr.mxu1 %v431_v7  ;;  %v424_v18 = vld [vmem:[#allocation12 + $0xa0] sm:$0xff]  ;;  %v423_v19 = vld [vmem:[#allocation12 + $0x98] sm:$0xff]  ;;  %v320_v20 = vld [vmem:[#allocation11 + $0x48] sm:$0xff]  ;;  %p1147_p4 = scmp.ne.s32.totalorder %s722_s26, %s1146_s14  ;;  %s1252_s0 = smov [#allocation14]  }
  0x6a   : > { %894 = vmatpush3.msra.mxu0 %v324_v8  ;;  %441 = vmatpush1.msra.mxu1 %v430_v9  ;;  %v422_v21 = vld [vmem:[#allocation12 + $0x90] sm:$0xff]  ;;  %v421_v22 = vld [vmem:[#allocation12 + $0x88] sm:$0xff]  ;;  %v319_v23 = vld [vmem:[#allocation11 + $0x40] sm:$0xff]  ;;  %s1150_s7 = sshll.u32 %s1252_s0, 4  ;;  %s1151_s7 = int_to_ptr.vmem [resolvable:$false] %s1150_s7 }
  0x6b   : > { %895 = vmatprep.subr.mxu0 %v1248_v0  ;;  %442 = vmatprep.subr.mxu1 %v429_v10  ;;  %v420_v24 = vld [vmem:[#allocation12 + $0x80] sm:$0xff]  ;;  %v419_v25 = vld [vmem:[#allocation12 + $0x78] sm:$0xff]  ;;  %v418_v27 = vld [vmem:[#allocation12 + $0x70] sm:$0xff]  ;;  %p1148_p3 = pnand %p1147_p4, %p1369_p9  ;;  %s1152_s18 = scalar_lea.vmem %s1151_s7, 256 }
  0x6c   : > { %896 = vmatpush3.msra.mxu0 %v323_v11  ;;  %443 = vmatpush1.msra.mxu1 %v428_v12  ;;  %v318_v26 = vld [vmem:[#allocation11 + $0x38] sm:$0xff]  ;;  %v417_v28 = vld [vmem:[#allocation12 + $0x68] sm:$0xff]  ;;  %v317_v29 = vld [vmem:[#allocation11 + $0x30] sm:$0xff]  ;;  %p1153_p13 = scmp.lt.s32.totalorder %s722_s26, %s1151_s7  ;;  %p1154_p5 = scmp.lt.s32.totalorder %s1152_s18, %s1146_s14 }
  0x6d   : > { %897 = vmatprep.subr.mxu0 %v1248_v0  ;;  %444 = vmatprep.subr.mxu1 %v427_v13  ;;  %v416_v30 = vld [vmem:[#allocation12 + $0x60] sm:$0xff]  ;;  %v415_v31 = vld [vmem:[#allocation12 + $0x58] sm:$0xff]  ;;  %v316_v32 = vld [vmem:[#allocation11 + $0x28] sm:$0xff]  ;;  %p1149_p7 = pneg %p1148_p3 }
  0x6e   : > { %898 = vmatpush3.msra.mxu0 %v322_v14  ;;  %445 = vmatpush1.msra.mxu1 %v426_v15  ;;  %v414_v33 = vld [vmem:[#allocation12 + $0x50] sm:$0xff]  ;;  %v413_v34 = vld [vmem:[#allocation12 + $0x48] sm:$0xff]  ;;  %v315_v35 = vld [vmem:[#allocation11 + $0x20] sm:$0xff]  ;;  %p1155_p10 = por %p1154_p5, %p1153_p13 }
  0x6f   : > { %899 = vmatprep.subr.mxu0 %v1248_v0  ;;  %446 = vmatprep.subr.mxu1 %v425_v16  ;;  %v412_v36 = vld [vmem:[#allocation12 + $0x40] sm:$0xff]  ;;  %v411_v37 = vld [vmem:[#allocation12 + $0x38] sm:$0xff]  ;;  %v410_v39 = vld [vmem:[#allocation12 + $0x30] sm:$0xff] }
  0x70   : > { %900 = vmatpush3.msra.mxu0 %v321_v17  ;;  %447 = vmatpush1.msra.mxu1 %v424_v18  ;;  %v314_v38 = vld [vmem:[#allocation11 + $0x18] sm:$0xff]  ;;  %v409_v40 = vld [vmem:[#allocation12 + $0x28] sm:$0xff]  ;;  %v313_v41 = vld [vmem:[#allocation11 + $0x10] sm:$0xff]  ;;  %p1156_p1 = pnand %p1155_p10, %p1149_p7 }
  0x71   : > { %901 = vmatprep.subr.mxu0 %v1248_v0  ;;  %448 = vmatprep.subr.mxu1 %v423_v19  ;;  %v408_v42 = vld [vmem:[#allocation12 + $0x20] sm:$0xff]  ;;  %v407_v43 = vld [vmem:[#allocation12 + $0x18] sm:$0xff]  ;;  %v312_v44 = vld [vmem:[#allocation11 + $0x8] sm:$0xff] }
  0x72   : > { %902 = vmatpush3.msra.mxu0 %v320_v20  ;;  %449 = vmatpush1.msra.mxu1 %v422_v21  ;;  %v406_v45 = vld [vmem:[#allocation12 + $0x10] sm:$0xff]  ;;  %v405_v46 = vld [vmem:[#allocation12 + $0x8] sm:$0xff]  ;;  %v311_v47 = vld [vmem:[#allocation11] sm:$0xff] }
  0x73   : > { %903 = vmatprep.subr.mxu0 %v1248_v0  ;;  %450 = vmatprep.subr.mxu1 %v421_v22  ;;  %v404_v48 = vld [vmem:[#allocation12] sm:$0xff]  ;;  %v403_v50 = vld [vmem:[%s268_s28] sm:$0xff] }
  0x74   : > { %904 = vmatpush3.msra.mxu0 %v319_v23  ;;  %451 = vmatpush1.msra.mxu1 %v420_v24  ;;  %v310_v49 = vld [vmem:[%s259_s11] sm:$0xff]  ;;  %v585_v1 = vld [vmem:[#allocation3] sm:$0xff]  ;;  %v602_v11 = vld [vmem:[#allocation4] sm:$0xff] }
  0x75   : > { %905 = vmatprep.subr.mxu0 %v1248_v0  ;;  %452 = vmatprep.subr.mxu1 %v419_v25 }
  0x76   : > { %906 = vmatpush3.msra.mxu0 %v318_v26  ;;  %453 = vmatpush1.msra.mxu1 %v418_v27 }
  0x77   : > { %907 = vmatprep.subr.mxu0 %v1248_v0  ;;  %454 = vmatprep.subr.mxu1 %v417_v28 }
  0x78   : > { %908 = vmatpush3.msra.mxu0 %v317_v29  ;;  %455 = vmatpush1.msra.mxu1 %v416_v30 }
  0x79   : > { %909 = vmatprep.subr.mxu0 %v1248_v0  ;;  %456 = vmatprep.subr.mxu1 %v415_v31 }
  0x7a   : > { %910 = vmatpush3.msra.mxu0 %v316_v32  ;;  %457 = vmatpush1.msra.mxu1 %v414_v33 }
  0x7b   : > { %911 = vmatprep.subr.mxu0 %v1248_v0  ;;  %458 = vmatprep.subr.mxu1 %v413_v34 }
  0x7c   : > { %912 = vmatpush3.msra.mxu0 %v315_v35  ;;  %459 = vmatpush1.msra.mxu1 %v412_v36 }
  0x7d   : > { %913 = vmatprep.subr.mxu0 %v1248_v0  ;;  %460 = vmatprep.subr.mxu1 %v411_v37 }
  0x7e   : > { %914 = vmatpush3.msra.mxu0 %v314_v38  ;;  %461 = vmatpush1.msra.mxu1 %v410_v39 }
  0x7f   : > { %915 = vmatprep.subr.mxu0 %v1248_v0  ;;  %462 = vmatprep.subr.mxu1 %v409_v40 }
  0x80   : > { %916 = vmatpush3.msra.mxu0 %v313_v41  ;;  %463 = vmatpush1.msra.mxu1 %v408_v42 }
  0x81   : > { %917 = vmatprep.subr.mxu0 %v1248_v0  ;;  %464 = vmatprep.subr.mxu1 %v407_v43 }
  0x82   : > { %918 = vmatpush3.msra.mxu0 %v312_v44  ;;  %465 = vmatpush1.msra.mxu1 %v406_v45 }
  0x83   : > { %919 = vmatprep.subr.mxu0 %v1248_v0  ;;  %466 = vmatprep.subr.mxu1 %v405_v46 }
  0x84   : > { %920 = vmatpush3.msra.mxu0 %v311_v47  ;;  %467 = vmatpush1.msra.mxu1 %v404_v48 }
  0x85   : > { %922 = vmatmul.mubr.f32.vlgmr.msra.gmra.mxu0 %v310_v49  ;;  %501 = vmatmul.mubr.f32.vlgmr.msra.gmra.mxu1 %v403_v50 }
  0x86   : > { %924 = vmatprep.subr.mxu0 %v1248_v0  ;;  %929 = vmatprep.subr.mxu1 %v1248_v0 }
  0x87   : > { %926 = vmatprep.mubr.msk.f32.mxu0 %vm1249_vm0, %v1248_v0  ;;  %931 = vmatprep.mubr.msk.f32.mxu1 %vm1249_vm0, %v1248_v0 }
  0x88   : > { %1030 = vset.pattern.permute.xlu0 %v1251_v63  ;;  %1031 = vset.pattern.permute.xlu1 %v1251_v63 }
 0x145   : > { %v393_v51 = vpop.f32.mrf.mxu0  ;;  %v502_v53 = vpop.f32.mrf.mxu1 }
 0x146   : > { %v397_v52 = vmul.f32 0.57735026, %v393_v51  ;;  %925 = vmatpush3.xpose.msra.mxu0 %v502_v53 }
 0x147   : > { %v923_v54 = vpop.f32.mrf.mxu0  ;;  %v504_v55 = vpop.f32.mrf.mxu1 }
 0x148   : > { %930 = vmatpush3.msra.mxu1 %v504_v55 }
 0x149   : > { %927 = vmatmul.mubr.f32.vlgmr.msra.gmra.mxu0 %v397_v52 }
 0x209   : > { %v574_v59 = vpop.f32.mrf.mxu0 }
 0x20a   : > { %v584_v60 = vsel %vm583_vm2, %v574_v59, -1e+30 }
 0x20b   : > { %v928_v61 = vpop.f32.mrf.mxu0  ;;  %v587_v62 = vsel %vm586_vm3, %v584_v60, -inf }
 0x20c   : > { %588 = vmax.xlane.f32.xlu0 %v587_v62 }
 0x295   : > { %v589_v2 = vpop.xlane.xlu0 %588 }
 0x296   : > { %v590_v3 = vmax.f32 %v585_v1, %v589_v2 }
 0x298   : > { %v591_v4 = vsub.f32 %v585_v1, %v590_v3  ;;  %692 = vst.msk [vmem:[#allocation3] sm:$0xff] %vm399_vm1, %v590_v3  ;;  %596 = vperm.xlu0 %1030, %v590_v3  }
 0x29a   : > { %v592_v8 = vmul.f32 1.442695, %v591_v4 }
 0x313   : > { %v597_v0 = vpop.permute.xlu0 %596 }
 0x314   : > { %v599_v5 = vsub.f32 %v584_v60, %v597_v0 }
 0x316   : > { %v600_v6 = vmul.f32 1.442695, %v599_v5 }
 0x318   : > { %1032 = vpow2.f32 %v600_v6 }
 0x319   : > { %1034 = vpow2.f32 %v592_v8 }
 0x325   : > { %v1033_v7 = vpop.eup %1032 }
 0x326   : > { %932 = vmatmul.mubr.msk.f32.vlgmr.msra.gmra.mxu1 %vm586_vm3, %v1033_v7  ;;  %v604_v9 = vsel %vm586_vm3, %v1033_v7, 0.0  ;;  %v1035_v10 = vpop.eup %1034 }
 0x327   : > { %605 = vadd.xlane.f32.xlu1 %v604_v9  ;;  %v603_v12 = vmul.f32 %v1035_v10, %v602_v11 }
 0x338   : > { %613 = vperm.xlu1 %1031, %v1035_v10  }
 0x3b0   : > { %v606_v13 = vpop.xlane.xlu1 %605 }
 0x3b1   : > { %v607_v14 = vadd.f32 %v606_v13, %v603_v12 }
 0x3b3   : > { %609 = vst.msk [vmem:[#allocation4] sm:$0xff] %vm399_vm1, %v607_v14 }
 0x3b4   : > { %v614_v19 = vpop.permute.xlu1 %613 }
 0x3b5   : > { %v616_v20 = vmul.f32 0.0, %v614_v19 }
 0x3ba   : > { %v696_v15 = vld [vmem:[#allocation4] sm:$0xff] }
 0x3bb   : > { %1036 = vrcp.f32 %v696_v15 }
 0x3c8   : > { %v1037_v16 = vpop.eup %1036 }
 0x3c9   : > { %701 = vperm.xlu1 %1031, %v1037_v16  }
 0x3e6   : > { %v686_v17 = vpop.f32.mrf.mxu1 }
 0x3e7   : > { %v690_v21 = vadd.f32 %v686_v17, %v616_v20 }
 0x3e8   : > { %v933_v18 = vpop.f32.mrf.mxu1 }
 0x444   : > { %v702_v22 = vpop.permute.xlu1 %701 }
 0x445   : > { %v704_v23 = vmul.f32 %v702_v22, %v690_v21 }
 0x447   : > { %705 = vst [vmem:[%s305_s23] sm:$0xff] %v704_v23 }
 0x448   : > { %1159 = shalt.err (!%p1156_p1)
}
 0x449   : > { %s1160_s8 = scalar_lea.hbm %s719_s5, 128  ;;  %s1164_s1 = scalar_lea.hbm %s1518_s4, 256 }
 0x44a   : > { %p1161_p2 = scmp.ne.s32.totalorder %s719_s5, %s1160_s8  ;;  %p1165_p11 = scmp.lt.s32.totalorder %s719_s5, %s1518_s4 }
 0x44b   : > { %p1166_p0 = scmp.lt.s32.totalorder %s1164_s1, %s1160_s8 }
 0x44c   : > { %p1162_p6 = pnand %p1161_p2, %p1369_p9 }
 0x44d   : > { %p1167_p12 = por %p1166_p0, %p1165_p11 }
 0x44e   : > { %p1163_p8 = pneg %p1162_p6 }
 0x450   : > { %p1168_p4 = pnand %p1167_p12, %p1163_p8 }
 0x452   : > { %1171 = shalt.err (!%p1168_p4)
}
 0x453   : > { %946 = dma.vmem_to_hbm [thread:$0]  (%p1369_p9), %s722_s26, 128, %s719_s5, %s707_s13  }
 0x454 PF: > { %s733_s12 = sand.u32 1, %s1218_s15   ;;  %p1535_p3 = scmp.ne.s32.totalorder %s1523_s24, 0 }
 0x455   : > { %p1536_p7 = scmp.ge.s32.totalorder %s1238_s20, 2  ;;  %s734_s28 = scalar_lea.sflag [#allocation8], %s733_s12 }
 0x457   : > { %p963_p13 = pnand %p1536_p7, %p1535_p3 }
 0x459   : > { %p964_p5 = pneg %p963_p13 }
 0x45b   : > { %1213 = dma.done.wait (%p964_p5), %s734_s28, 128  }
 0x45c   : > { %1215 = vsyncadd (%p964_p5), %s734_s28, 4294967168  ;;  %s24_s20 = sadd.s32 1, %s1238_s20   ;;  %s1537_s15 = smov %s1222_s16 }
 0x45d   : > { %p21_p10 = scmp.ge.s32.totalorder %s24_s20, 4   ;;  %s1538_s16 = smov %s1226_s17 }
 0x45e   : > { %s1539_s17 = smov %s1378_s6  ;;  %s1540_s18 = smov %s1234_s19 }
 0x45f   : > { %s1541_s19 = smov %s1543_s22  ;;  %23 = sbr.rel (!%p21_p10) target bundleno = 12 (0xc), region = 110 }
 0x464   :  { %739 = vsyncpa [#allocation7], 1 }
 0x465   :  { %741 = vsyncpa [#allocation7 + $0x1], 1 }
 0x466   :  { %742 = vsyncpa [#allocation10], 1 }
 0x467   :  { %744 = vsyncpa [#allocation10 + $0x1], 1 }
 0x468   :  { %745 = vsyncpa [#allocation13], 1 }
 0x469   :  { %746 = vsyncpa [#allocation8], 1 }
 0x46a   :  { %748 = vsyncpa [#allocation8 + $0x1], 1 }

</bundles_post_ra>
